<compile_context>
chip_gen: v7x
topology: tpu7x:2x2x1
jax: 0.10.0
libtpu: 0.0.40
codegen_flags: <defaults>
</compile_context>

<pallas_src>
import functools

import jax
import jax.numpy as jnp
from jax.experimental import pallas as pl
from jax.experimental.pallas import tpu as pltpu

_LN_EPS = 1e-12          # BERT config.layer_norm_eps default
_INV_SQRT2 = 0.7071067811865476


def _gelu_exact(x):
    # transformers ACT2FN["gelu"] == exact erf-based GELU.
    return 0.5 * x * (1.0 + jax.lax.erf(x * _INV_SQRT2))


def _pick_tile(n, pref, aligns):
    """Largest tile <= pref that divides n and is a multiple of one of `aligns`
    (tried in order); falls back to the full extent n."""
    if n <= pref:
        return n
    for align in aligns:
        t = (pref // align) * align
        while t >= align:
            if n % t == 0:
                return t
            t -= align
    return n


def _row_chunk(tm, pref=256):
    """Largest multiple of 8 <= pref dividing tm (bounds transform f32 temporaries)."""
    for cand in range(min(tm, pref), 7, -8):
        if tm % cand == 0:
            return cand
    return tm


# --------------------------------------------------------------------------------------
# LM prediction head (transform + decoder), tiled over rows (outer, parallel) and
# vocab (inner, arbitrary).
# --------------------------------------------------------------------------------------
def _lm_head_kernel(x_ref, w1t_ref, b1_ref, g_ref, be_ref, w2t_ref, b2_ref,
                    out_ref, t_ref, *, rc):
    """On the first vocab tile of each row tile, compute the transform
    (dense + gelu + LayerNorm) once into the bf16 scratch `t_ref`, in <= rc-row
    chunks so f32 temporaries stay small.  Every vocab tile then does a single
    bf16 MXU matmul against the streamed (H, TV) decoder-weight tile."""
    j = pl.program_id(1)  # vocab-tile index (inner, "arbitrary")

    @pl.when(j == 0)
    def _():
        w1 = w1t_ref[...]                       # bf16 (H, H), VMEM-resident
        b1 = b1_ref[...]                        # f32 (1, H)
        g = g_ref[...]                          # f32 (1, H)
        be = be_ref[...]                        # f32 (1, H)
        tm = t_ref.shape[0]
        for r0 in range(0, tm, rc):             # static bounds -> straight-line code
            xc = x_ref[r0:r0 + rc, :]           # bf16 (rc, H)
            h = jnp.dot(xc, w1, preferred_element_type=jnp.float32) + b1
            h = _gelu_exact(h)
            mu = jnp.mean(h, axis=-1, keepdims=True)
            var = jnp.mean((h - mu) ** 2, axis=-1, keepdims=True)
            hn = (h - mu) * jax.lax.rsqrt(var + _LN_EPS)
            t_ref[r0:r0 + rc, :] = (hn * g + be).astype(t_ref.dtype)

    # decoder: bf16 (TM, H) @ bf16 (H, TV) -> f32 accumulate, + bias, lane-dense store.
    out_ref[...] = (
        jnp.dot(t_ref[...], w2t_ref[...], preferred_element_type=jnp.float32)
        + b2_ref[...]
    ).astype(out_ref.dtype)


# --------------------------------------------------------------------------------------
# One-time weight preprocessing (do this OUTSIDE the jitted forward, once per model).
# --------------------------------------------------------------------------------------
def prepare_qdqbert_heads_params(t_weight, t_bias, ln_gamma, ln_beta,
                                 dec_weight, dec_bias, sr_weight, sr_bias,
                                 compute_dtype=jnp.bfloat16):
    """Transpose torch (out, in) layouts to (in, out), cast MXU operands to
    `compute_dtype`, and pad the vocab dim to a multiple of 128.
    Returns (params_dict, vocab_size)."""
    H = t_weight.shape[0]
    V = dec_weight.shape[0]
    Vp = ((V + 127) // 128) * 128

    w2t = jnp.asarray(dec_weight, jnp.float32).T          # (H, V)
    b2 = jnp.asarray(dec_bias, jnp.float32)
    if Vp != V:
        w2t = jnp.pad(w2t, ((0, 0), (0, Vp - V)))
        b2 = jnp.pad(b2, (0, Vp - V))

    params = dict(
        w1t=jnp.asarray(t_weight, jnp.float32).T.astype(compute_dtype),   # (H, H)
        b1=jnp.asarray(t_bias, jnp.float32).reshape(1, H),
        gamma=jnp.asarray(ln_gamma, jnp.float32).reshape(1, H),
        beta=jnp.asarray(ln_beta, jnp.float32).reshape(1, H),
        w2t=w2t.astype(compute_dtype),                                    # (H, Vp)
        b2=b2.reshape(1, Vp),
        srt=jnp.asarray(sr_weight, jnp.float32).T,                        # (H, 2), f32
        srb=jnp.asarray(sr_bias, jnp.float32).reshape(1, -1),
    )
    return params, V


@functools.partial(jax.jit, static_argnames=("vocab_size", "tm", "tv"))
def qdq_bert_pretraining_heads(sequence_output, pooled_output, params, *,
                               vocab_size=None, tm=1024, tv=1024):
    """sequence_output: (B, S, H); pooled_output: (B, H); params from
    prepare_qdqbert_heads_params. Returns (prediction_scores (B,S,V),
    seq_relationship_score (B,2))."""
    B, S, H = sequence_output.shape
    Vp = params["w2t"].shape[1]
    V = Vp if vocab_size is None else vocab_size
    compute_dtype = params["w1t"].dtype

    M = B * S
    Mp = ((M + 7) // 8) * 8
    x = sequence_output.reshape(M, H).astype(compute_dtype)
    if Mp != M:
        x = jnp.pad(x, ((0, Mp - M), (0, 0)))

    # TM is the only lever on decoder-weight re-streaming ((Mp/TM)*H*Vp bytes of HBM
    # traffic), so take it as large as VMEM allows; TV amortizes per-grid-step overhead
    # and keeps output stores lane-dense.
    # TODO(synk): on v7x (2 TCs) prefer Mp/TM >= 2 so the "parallel" row axis splits
    # across both TensorCores; also a pipeline_mode=pl.Buffered(1) on the constant-index
    # w1t/b1/gamma/beta specs would trim one resident (H,H) buffer of VMEM.
    TM = _pick_tile(Mp, tm, (128, 8))
    TV = _pick_tile(Vp, tv, (128,))
    rc = _row_chunk(TM)

    kernel = functools.partial(_lm_head_kernel, rc=rc)

    pred = pl.pallas_call(
        kernel,
        out_shape=jax.ShapeDtypeStruct((Mp, Vp), sequence_output.dtype),
        grid_spec=pltpu.PrefetchScalarGridSpec(
            num_scalar_prefetch=0,
            grid=(Mp // TM, Vp // TV),
            in_specs=[
                pl.BlockSpec((TM, H), lambda i, j: (i, 0)),   # activations (bf16), row tile
                pl.BlockSpec((H, H), lambda i, j: (0, 0)),    # transform weight (bf16), resident
                pl.BlockSpec((1, H), lambda i, j: (0, 0)),    # transform bias (f32)
                pl.BlockSpec((1, H), lambda i, j: (0, 0)),    # LN gamma (f32)
                pl.BlockSpec((1, H), lambda i, j: (0, 0)),    # LN beta (f32)
                pl.BlockSpec((H, TV), lambda i, j: (0, j)),   # decoder weight tile (bf16)
                pl.BlockSpec((1, TV), lambda i, j: (0, j)),   # decoder bias tile (f32)
            ],
            out_specs=pl.BlockSpec((TM, TV), lambda i, j: (i, j)),
            scratch_shapes=[pltpu.VMEM((TM, H), compute_dtype)],   # transformed rows (bf16)
        ),
        compiler_params=pltpu.CompilerParams(
            dimension_semantics=("parallel", "arbitrary"),
            vmem_limit_bytes=48 * 1024 * 1024,
        ),
    )(x, params["w1t"], params["b1"], params["gamma"], params["beta"],
      params["w2t"], params["b2"])

    pred = pred[:M, :V].reshape(B, S, V)

    # NSP head: (B, H) @ (H, 2) is too small for a pallas_call (2-wide output would
    # force masked stores); leave it to XLA per the perf review.
    seq_rel = (pooled_output.astype(jnp.float32) @ params["srt"]
               + params["srb"]).astype(pooled_output.dtype)
    return pred, seq_rel


# --------------------------------------------------------------------------------------
# Pure-JAX f32 reference (correctness check).
# --------------------------------------------------------------------------------------
def _reference(sequence_output, pooled_output, t_weight, t_bias, ln_gamma, ln_beta,
               dec_weight, dec_bias, sr_weight, sr_bias):
    h = sequence_output @ t_weight.T + t_bias
    h = _gelu_exact(h)
    mu = h.mean(-1, keepdims=True)
    var = ((h - mu) ** 2).mean(-1, keepdims=True)
    h = (h - mu) / jnp.sqrt(var + _LN_EPS) * ln_gamma + ln_beta
    pred = h @ dec_weight.T + dec_bias
    seq_rel = pooled_output @ sr_weight.T + sr_bias
    return pred, seq_rel


if __name__ == "__main__":
    B, S, H, V = 2, 8, 32, 384   # small shapes; V multiple of 128

    key = jax.random.PRNGKey(0)
    ks = jax.random.split(key, 10)

    sequence_output = jax.random.normal(ks[0], (B, S, H), dtype=jnp.float32)
    pooled_output = jax.random.normal(ks[1], (B, H), dtype=jnp.float32)

    t_weight = 0.05 * jax.random.normal(ks[2], (H, H), dtype=jnp.float32)     # transform.dense.weight (out,in)
    t_bias = 0.01 * jax.random.normal(ks[3], (H,), dtype=jnp.float32)
    ln_gamma = 1.0 + 0.01 * jax.random.normal(ks[4], (H,), dtype=jnp.float32) # transform.LayerNorm.weight
    ln_beta = 0.01 * jax.random.normal(ks[5], (H,), dtype=jnp.float32)
    dec_weight = 0.05 * jax.random.normal(ks[6], (V, H), dtype=jnp.float32)   # decoder.weight (vocab, hidden)
    dec_bias = 0.01 * jax.random.normal(ks[7], (V,), dtype=jnp.float32)       # predictions.bias
    sr_weight = 0.05 * jax.random.normal(ks[8], (2, H), dtype=jnp.float32)    # seq_relationship.weight
    sr_bias = 0.01 * jax.random.normal(ks[9], (2,), dtype=jnp.float32)

    # One-time weight prep (transpose + bf16 cast + vocab padding), outside the jit.
    params, vocab = prepare_qdqbert_heads_params(
        t_weight, t_bias, ln_gamma, ln_beta, dec_weight, dec_bias,
        sr_weight, sr_bias, compute_dtype=jnp.bfloat16)

    pred, seq_rel = qdq_bert_pretraining_heads(
        sequence_output, pooled_output, params, vocab_size=vocab)
    jax.block_until_ready((pred, seq_rel))

    ref_pred, ref_seq = _reference(
        sequence_output, pooled_output, t_weight, t_bias, ln_gamma, ln_beta,
        dec_weight, dec_bias, sr_weight, sr_bias)

    assert pred.shape == (B, S, V)
    assert seq_rel.shape == (B, 2)
    # bf16 MXU inputs with f32 accumulation -> loosened tolerance vs. the f32 reference.
    assert jnp.allclose(pred, ref_pred, rtol=2e-2, atol=2e-2), (
        "max abs err:", float(jnp.max(jnp.abs(pred - ref_pred))))
    assert jnp.allclose(seq_rel, ref_seq, rtol=1e-4, atol=1e-4)
    print("KERNEL_OK")
</pallas_src>

<mosaic_0001>
module attributes {stable_mosaic.version = 11 : i64} {
  func.func @_lm_head_kernel(%arg0: i32, %arg1: i32, %arg2: memref<16x32xbf16, #tpu.memory_space<vmem>>, %arg3: memref<32x32xbf16, #tpu.memory_space<vmem>>, %arg4: memref<1x32xf32, #tpu.memory_space<vmem>>, %arg5: memref<1x32xf32, #tpu.memory_space<vmem>>, %arg6: memref<1x32xf32, #tpu.memory_space<vmem>>, %arg7: memref<32x384xbf16, #tpu.memory_space<vmem>>, %arg8: memref<1x384xf32, #tpu.memory_space<vmem>>, %arg9: memref<16x384xf32, #tpu.memory_space<vmem>>, %arg10: memref<16x32xbf16, #tpu.memory_space<vmem>>) attributes {dimension_semantics = [#tpu.dimension_semantics<parallel>, #tpu.dimension_semantics<arbitrary>], iteration_bounds = array<i64: 1, 1>, scalar_prefetch = 0 : i64, scratch_operands = 1 : i64, tpu.core_type = #tpu.core_type<tc>, window_params = [{transform_indices = @transform_0, window_bounds = array<i64: 16, 32>}, {pipeline_mode = #tpu.pipeline_mode<synchronous>, transform_indices = @transform_1, window_bounds = array<i64: 32, 32>}, {pipeline_mode = #tpu.pipeline_mode<synchronous>, transform_indices = @transform_2, window_bounds = array<i64: 1, 32>}, {pipeline_mode = #tpu.pipeline_mode<synchronous>, transform_indices = @transform_3, window_bounds = array<i64: 1, 32>}, {pipeline_mode = #tpu.pipeline_mode<synchronous>, transform_indices = @transform_4, window_bounds = array<i64: 1, 32>}, {transform_indices = @transform_5, window_bounds = array<i64: 32, 384>}, {transform_indices = @transform_6, window_bounds = array<i64: 1, 384>}, {transform_indices = @transform_7, window_bounds = array<i64: 16, 384>}]} {
    %c0_i32 = arith.constant 0 : i32
    %0 = arith.cmpi eq, %arg1, %c0_i32 : i32
    %1 = arith.extui %0 : i1 to i32
    %c0_i32_0 = arith.constant 0 : i32
    %2 = arith.cmpi ne, %1, %c0_i32_0 : i32
    scf.if %2 {
      %c0_8 = arith.constant 0 : index
      %c0_9 = arith.constant 0 : index
      %10 = vector.load %arg3[%c0_8, %c0_9] : memref<32x32xbf16, #tpu.memory_space<vmem>>, vector<32x32xbf16>
      %c0_10 = arith.constant 0 : index
      %c0_11 = arith.constant 0 : index
      %11 = vector.load %arg4[%c0_10, %c0_11] : memref<1x32xf32, #tpu.memory_space<vmem>>, vector<1x32xf32>
      %c0_12 = arith.constant 0 : index
      %c0_13 = arith.constant 0 : index
      %12 = vector.load %arg5[%c0_12, %c0_13] : memref<1x32xf32, #tpu.memory_space<vmem>>, vector<1x32xf32>
      %c0_14 = arith.constant 0 : index
      %c0_15 = arith.constant 0 : index
      %13 = vector.load %arg6[%c0_14, %c0_15] : memref<1x32xf32, #tpu.memory_space<vmem>>, vector<1x32xf32>
      %c0_16 = arith.constant 0 : index
      %c0_17 = arith.constant 0 : index
      %14 = vector.load %arg2[%c0_16, %c0_17] : memref<16x32xbf16, #tpu.memory_space<vmem>>, vector<16x32xbf16>
      %cst_18 = arith.constant dense<0.000000e+00> : vector<16x32xf32>
      %15 = tpu.matmul %14, %10, %cst_18 {dimension_numbers = #tpu.dot_dimension_numbers<[1], [0], [0], [1], [0, 0, 1, 1], [], []>} : vector<16x32xbf16>, vector<32x32xbf16>, vector<16x32xf32> -> vector<16x32xf32>
      %16 = vector.broadcast %11 : vector<1x32xf32> to vector<16x32xf32>
      %17 = arith.addf %15, %16 : vector<16x32xf32>
      %cst_19 = arith.constant 5.000000e-01 : f32
      %18 = vector.broadcast %cst_19 : f32 to vector<16x32xf32>
      %19 = arith.mulf %18, %17 : vector<16x32xf32>
      %cst_20 = arith.constant 0.707106769 : f32
      %20 = vector.broadcast %cst_20 : f32 to vector<16x32xf32>
      %21 = arith.mulf %17, %20 : vector<16x32xf32>
      %22 = math.erf %21 : vector<16x32xf32>
      %cst_21 = arith.constant 1.000000e+00 : f32
      %23 = vector.broadcast %cst_21 : f32 to vector<16x32xf32>
      %24 = arith.addf %23, %22 : vector<16x32xf32>
      %25 = arith.mulf %19, %24 : vector<16x32xf32>
      %cst_22 = arith.constant dense<0.000000e+00> : vector<16xf32>
      %26 = vector.multi_reduction <add>, %25, %cst_22 [1] : vector<16x32xf32> to vector<16xf32>
      %27 = vector.shape_cast %26 : vector<16xf32> to vector<16x1xf32>
      %cst_23 = arith.constant 3.200000e+01 : f32
      %28 = vector.broadcast %cst_23 : f32 to vector<16x1xf32>
      %29 = arith.divf %27, %28 : vector<16x1xf32>
      %30 = vector.broadcast %29 : vector<16x1xf32> to vector<16x32xf32>
      %31 = arith.subf %25, %30 : vector<16x32xf32>
      %32 = arith.mulf %31, %31 : vector<16x32xf32>
      %cst_24 = arith.constant dense<0.000000e+00> : vector<16xf32>
      %33 = vector.multi_reduction <add>, %32, %cst_24 [1] : vector<16x32xf32> to vector<16xf32>
      %34 = vector.shape_cast %33 : vector<16xf32> to vector<16x1xf32>
      %cst_25 = arith.constant 3.200000e+01 : f32
      %35 = vector.broadcast %cst_25 : f32 to vector<16x1xf32>
      %36 = arith.divf %34, %35 : vector<16x1xf32>
      %37 = vector.broadcast %29 : vector<16x1xf32> to vector<16x32xf32>
      %38 = arith.subf %25, %37 : vector<16x32xf32>
      %cst_26 = arith.constant 9.99999996E-13 : f32
      %39 = vector.broadcast %cst_26 : f32 to vector<16x1xf32>
      %40 = arith.addf %36, %39 : vector<16x1xf32>
      %41 = math.rsqrt %40 : vector<16x1xf32>
      %42 = vector.broadcast %41 : vector<16x1xf32> to vector<16x32xf32>
      %43 = arith.mulf %38, %42 : vector<16x32xf32>
      %44 = vector.broadcast %12 : vector<1x32xf32> to vector<16x32xf32>
      %45 = arith.mulf %43, %44 : vector<16x32xf32>
      %46 = vector.broadcast %13 : vector<1x32xf32> to vector<16x32xf32>
      %47 = arith.addf %45, %46 : vector<16x32xf32>
      %48 = arith.truncf %47 : vector<16x32xf32> to vector<16x32xbf16>
      %c0_27 = arith.constant 0 : index
      %c0_28 = arith.constant 0 : index
      %49 = vector.load %arg10[%c0_27, %c0_28] : memref<16x32xbf16, #tpu.memory_space<vmem>>, vector<16x32xbf16>
      tpu.vector_store %arg10[%c0_27, %c0_28], %48 {strides = array<i32>} : memref<16x32xbf16, #tpu.memory_space<vmem>>, vector<16x32xbf16>,
    } else {
    }
    %c0 = arith.constant 0 : index
    %c0_1 = arith.constant 0 : index
    %3 = vector.load %arg10[%c0, %c0_1] : memref<16x32xbf16, #tpu.memory_space<vmem>>, vector<16x32xbf16>
    %c0_2 = arith.constant 0 : index
    %c0_3 = arith.constant 0 : index
    %4 = vector.load %arg7[%c0_2, %c0_3] : memref<32x384xbf16, #tpu.memory_space<vmem>>, vector<32x384xbf16>
    %cst = arith.constant dense<0.000000e+00> : vector<16x384xf32>
    %5 = tpu.matmul %3, %4, %cst {dimension_numbers = #tpu.dot_dimension_numbers<[1], [0], [0], [1], [0, 0, 1, 1], [], []>} : vector<16x32xbf16>, vector<32x384xbf16>, vector<16x384xf32> -> vector<16x384xf32>
    %c0_4 = arith.constant 0 : index
    %c0_5 = arith.constant 0 : index
    %6 = vector.load %arg8[%c0_4, %c0_5] : memref<1x384xf32, #tpu.memory_space<vmem>>, vector<1x384xf32>
    %7 = vector.broadcast %6 : vector<1x384xf32> to vector<16x384xf32>
    %8 = arith.addf %5, %7 : vector<16x384xf32>
    %c0_6 = arith.constant 0 : index
    %c0_7 = arith.constant 0 : index
    %9 = vector.load %arg9[%c0_6, %c0_7] : memref<16x384xf32, #tpu.memory_space<vmem>>, vector<16x384xf32>
    tpu.vector_store %arg9[%c0_6, %c0_7], %8 {strides = array<i32>} : memref<16x384xf32, #tpu.memory_space<vmem>>, vector<16x384xf32>,
    return
  }
  func.func @transform_0(%arg0: i32, %arg1: i32) -> (i32, i32) {
    %c0_i32 = arith.constant 0 : i32
    %c0_i32_0 = arith.constant 0 : i32
    return %arg0, %c0_i32 : i32, i32
  }
  func.func @transform_1(%arg0: i32, %arg1: i32) -> (i32, i32) {
    %c0_i32 = arith.constant 0 : i32
    %c0_i32_0 = arith.constant 0 : i32
    %c0_i32_1 = arith.constant 0 : i32
    return %c0_i32, %c0_i32_0 : i32, i32
  }
  func.func @transform_2(%arg0: i32, %arg1: i32) -> (i32, i32) {
    %c0_i32 = arith.constant 0 : i32
    %c0_i32_0 = arith.constant 0 : i32
    %c0_i32_1 = arith.constant 0 : i32
    return %c0_i32, %c0_i32_0 : i32, i32
  }
  func.func @transform_3(%arg0: i32, %arg1: i32) -> (i32, i32) {
    %c0_i32 = arith.constant 0 : i32
    %c0_i32_0 = arith.constant 0 : i32
    %c0_i32_1 = arith.constant 0 : i32
    return %c0_i32, %c0_i32_0 : i32, i32
  }
  func.func @transform_4(%arg0: i32, %arg1: i32) -> (i32, i32) {
    %c0_i32 = arith.constant 0 : i32
    %c0_i32_0 = arith.constant 0 : i32
    %c0_i32_1 = arith.constant 0 : i32
    return %c0_i32, %c0_i32_0 : i32, i32
  }
  func.func @transform_5(%arg0: i32, %arg1: i32) -> (i32, i32) {
    %c0_i32 = arith.constant 0 : i32
    %c0_i32_0 = arith.constant 0 : i32
    return %c0_i32, %arg1 : i32, i32
  }
  func.func @transform_6(%arg0: i32, %arg1: i32) -> (i32, i32) {
    %c0_i32 = arith.constant 0 : i32
    %c0_i32_0 = arith.constant 0 : i32
    return %c0_i32, %arg1 : i32, i32
  }
  func.func @transform_7(%arg0: i32, %arg1: i32) -> (i32, i32) {
    %c0_i32 = arith.constant 0 : i32
    return %arg0, %arg1 : i32, i32
  }
}

</mosaic_0001>

<bundles_post_ra>
// kernel: qdq_bert_pretraining_heads.1
= control target key start
LH: loop header
LB: loop body
LE: loop exit
PB: predicated region body
PF: predicated region fallthrough
CT: control target
= control target key end

     0   :  { %12 = vsyncpa [#allocation4], 0  ;;  %s562_s0 = inlined_call_operand.vmem [shape: bf16[16,32], index: 0, kind: input, shape index: {}]   ;;  %s563_s1 = inlined_call_operand.vmem [shape: bf16[32,32], index: 1, kind: input, shape index: {}]   ;;  %s564_s2 = inlined_call_operand.vmem [shape: f32[1,32], index: 2, kind: input, shape index: {}]   ;;  %s565_s3 = inlined_call_operand.vmem [shape: f32[1,32], index: 3, kind: input, shape index: {}]   ;;  %s566_s4 = inlined_call_operand.vmem [shape: f32[1,32], index: 4, kind: input, shape index: {}]   ;;  %s567_s5 = inlined_call_operand.hbm [shape: bf16[32,384], index: 5, kind: input, shape index: {}]   ;;  %s568_s6 = inlined_call_operand.vmem [shape: f32[1,384], index: 6, kind: input, shape index: {}]   ;;  %s569_s7 = inlined_call_operand.hbm [shape: f32[16,384], index: 7, kind: output, shape index: {}]  }
   0x1   :  { %13 = vsyncpa [#allocation5], 0  ;;  %s460_s24 = smov [#allocation3]   ;;  %s412_s28 = scalar_lea.hbm %s567_s5, 768 }
   0x2   :  { %s29_s25 = sshll.u32 %s460_s24, 4  ;;  %p413_p0 = scmp.ne.s32.totalorder %s567_s5, %s412_s28  ;;  %s30_s25 = int_to_ptr.vmem [resolvable:$true] %s29_s25 }
   0x3   :  { %p416_p1 = scmp.lt.u32.totalorder %s412_s28, %s567_s5 }
   0x5   :  { %p418_p2 = pnand %p416_p1, %p413_p0 }
   0x7   :  { %421 = shalt.err (!%p418_p2)
}
   0x8   :  { %s422_s10 = scalar_lea.vmem %s30_s25, 768  ;;  %p427_p4 = scmp.lt.s32.totalorder %s30_s25, %s30_s25 }
   0x9   :  { %p423_p3 = scmp.ne.s32.totalorder %s30_s25, %s422_s10  ;;  %p428_p5 = scmp.lt.s32.totalorder %s422_s10, %s422_s10 }
   0xb   :  { %p429_p6 = por %p428_p5, %p427_p4 }
   0xd   :  { %p430_p7 = pnand %p429_p6, %p423_p3 }
   0xf   :  { %433 = shalt.err (!%p430_p7)
}
  0x10   :  { %s461_s11 = smov 192   ;;  %s462_s12 = smov 12  }
  0x11   :  { %35 = dma.hbm_to_vmem [thread:$0]  %s567_s5, 768, %s30_s25, [#allocation4], %s461_s11, %s461_s11, %s462_s12  }
  0x12   :  { %456 = dma.done.wait [#allocation4], 768  }
  0x13   :  { %457 = vsyncadd [#allocation4], 4294966528  ;;  %v463_v0 = vmov 0.0   ;;  %vm464_vm0 = vmmov 0   ;;  %v393_v1 = vld [vmem:[%s563_s1] sm:$0xff]   ;;  %v394_v2 = vld [vmem:[%s563_s1 + $0x8] sm:$0xff]   ;;  %v189_v58 = vlaneseq }
  0x14   :  { %368 = vmatprep.subr.bf16.mxu0 %v463_v0  ;;  %372 = vmatprep.mubr.msk.bf16.mxu0 %vm464_vm0, %v463_v0  ;;  %v395_v3 = vld [vmem:[%s562_s0] sm:$0xff]   ;;  %vm78_vm1 = vcmask 261120   ;;  %v396_v33 = vld [vmem:[#allocation3 + $0x4] ss:$12 sps:$4 sm:$0xff]   ;;  %v398_v34 = vld [vmem:[#allocation3] ss:$12 sps:$4 sm:$0xff]  }
  0x15   :  { %369 = vmatpush3.bf16.msra.mxu0 %v393_v1  ;;  %v347_v4 = vld [vmem:[%s564_s2] ss:$0 sm:$0xff]  ;;  %v399_v35 = vld [vmem:[#allocation3 + $0x8] ss:$12 sps:$4 sm:$0xff]   ;;  %240 = vmatprep.subr.bf16.mxu1 %v396_v33  ;;  %v403_v38 = vld [vmem:[#allocation3 + $0x20] ss:$12 sps:$4 sm:$0xff]  }
  0x16   :  { %370 = vmatprep.subr.bf16.mxu0 %v463_v0  ;;  %v400_v36 = vld [vmem:[#allocation3 + $0x1c] ss:$12 sps:$4 sm:$0xff]   ;;  %241 = vmatpush1.bf16.msra.mxu1 %v398_v34  ;;  %v402_v37 = vld [vmem:[#allocation3 + $0x18] ss:$12 sps:$4 sm:$0xff]   ;;  %v465_v39 = vmov 0   ;;  %v190_v59 = vshrl.u32 %v189_v58, 7 }
  0x17   :  { %242 = vmatprep.subr.bf16.mxu1 %v400_v36  ;;  %272 = vmatprep.mubr.bf16.mxu1 %v465_v39  ;;  %v352_v48 = vld [vmem:[%s565_s3] ss:$0 sm:$0xff] }
  0x18   :  { %v353_v52 = vld [vmem:[%s566_s4] ss:$0 sm:$0xff]  ;;  %v191_v60 = vsub.s32 0, %v190_v59  ;;  %v199_v61 = vsub.s32 2, %v190_v59  ;;  %v195_v63 = vsub.s32 1, %v190_v59  ;;  %s466_s4 = smov [#allocation6]  }
  0x19   :  { %371 = vmatpush3.bf16.msra.mxu0 %v394_v2  ;;  %v187_v62 = vld [vmem:[%s568_s6] sm:$0x7]  ;;  %s335_s24 = sshll.u32 %s466_s4, 4  ;;  %s336_s24 = int_to_ptr.vmem [resolvable:$true] %s335_s24 }
  0x1a   :  { %376 = vmatprep.subr.bf16.mxu0 %v463_v0  ;;  %243 = vmatpush1.bf16.msra.mxu1 %v402_v37  ;;  %v200_v1 = vrot.slane %v187_v62, %v199_v61  ;;  %v196_v2 = vrot.slane %v187_v62, %v195_v63  ;;  %s434_s6 = scalar_lea.vmem %s336_s24, 768  ;;  %p439_p9 = scmp.lt.s32.totalorder %s336_s24, %s336_s24 }
  0x1b   :  { %p435_p8 = scmp.ne.s32.totalorder %s336_s24, %s434_s6  ;;  %p440_p10 = scmp.lt.s32.totalorder %s434_s6, %s434_s6 }
  0x1c   :  { %373 = vmatmul.mubr.msk.bf16.vlgmr.msra.gmra.mrb[0].mxu0 %vm78_vm1, %v395_v3 }
  0x1d   :  { %380 = vmatprep.mubr.msk.bf16.mxu0 %vm464_vm0, %v463_v0  ;;  %377 = vmatpush3.bf16.msra.mxu0 %v399_v35  ;;  %p441_p11 = por %p440_p10, %p439_p9 }
  0x1e   :  { %378 = vmatprep.subr.bf16.mxu0 %v463_v0  ;;  %v192_v0 = vrot.slane %v187_v62, %v191_v60 }
  0x1f   :  { %p442_p12 = pnand %p441_p11, %p435_p8 }
  0x21   :  { %379 = vmatpush3.bf16.msra.mxu0 %v403_v38 }
  0xef   :  { %v116_v5 = vpop.f32.mrb[0].mxu0 }
  0xf0   :  { %v117_v6 = vadd.f32 %v347_v4, %v116_v5  ;;  %v374_v7 = vpop.f32.mrb[1].mxu0 }
  0xf1   :  { %v119_v8 = vpop.f32.mrb[2].mxu0 }
  0xf2   :  { %v125_v9 = vmul.f32 0.70710677, %v117_v6  ;;  %v120_v10 = vadd.f32 %v347_v4, %v119_v8  ;;  %v375_v11 = vpop.f32.mrb[3].mxu0  ;;  %v123_v14 = vmul.f32 0.5, %v117_v6 }
  0xf4   :  { %404 = verf.f32 %v125_v9  ;;  %v126_v12 = vmul.f32 0.70710677, %v120_v10  ;;  %v124_v17 = vmul.f32 0.5, %v120_v10 }
  0xf6   :  { %406 = verf.f32 %v126_v12 }
  0xfe   :  { %v405_v13 = vpop.eup %404 }
  0xff   :  { %v129_v15 = vadd.f32 1.0, %v405_v13 }
 0x100   :  { %v407_v16 = vpop.eup %406 }
 0x101   :  { %v131_v18 = vmul.f32 %v129_v15, %v123_v14  ;;  %v130_v19 = vadd.f32 1.0, %v407_v16 }
 0x103   :  { %v133_v20 = vsel %vm78_vm1, %v131_v18, 0.0  ;;  %v132_v21 = vmul.f32 %v130_v19, %v124_v17 }
 0x104   :  { %134 = vadd.xlane.f32.xlu0 %v133_v20 }
 0x105   :  { %v136_v22 = vsel %vm78_vm1, %v132_v21, 0.0 }
 0x108   :  { %137 = vadd.xlane.f32.xlu0 %v136_v22 }
 0x191   :  { %v135_v23 = vpop.xlane.xlu0 %134 }
 0x192   :  { %v140_v24 = vmul.f32 0.03125, %v135_v23 }
 0x194   :  { %v142_v25 = vsub.f32 %v131_v18, %v140_v24 }
 0x195   :  { %v138_v26 = vpop.xlane.xlu0 %137 }
 0x196   :  { %v141_v27 = vmul.f32 0.03125, %v138_v26  ;;  %v144_v28 = vmul.f32 %v142_v25, %v142_v25 }
 0x198   :  { %v143_v29 = vsub.f32 %v132_v21, %v141_v27  ;;  %v146_v30 = vsel %vm78_vm1, %v144_v28, 0.0 }
 0x199   :  { %147 = vadd.xlane.f32.xlu1 %v146_v30 }
 0x19a   :  { %v145_v31 = vmul.f32 %v143_v29, %v143_v29 }
 0x19c   :  { %v149_v32 = vsel %vm78_vm1, %v145_v31, 0.0 }
 0x19d   :  { %150 = vadd.xlane.f32.xlu1 %v149_v32 }
 0x226   :  { %v148_v40 = vpop.xlane.xlu1 %147 }
 0x227   :  { %v152_v41 = vmul.f32 0.03125, %v148_v40 }
 0x229   :  { %v154_v42 = vadd.f32 1e-12, %v152_v41 }
 0x22a   :  { %v151_v43 = vpop.xlane.xlu1 %150 }
 0x22b   :  { %408 = vrsqrt.f32 %v154_v42  ;;  %v153_v44 = vmul.f32 0.03125, %v151_v43 }
 0x22d   :  { %v155_v45 = vadd.f32 1e-12, %v153_v44 }
 0x22f   :  { %410 = vrsqrt.f32 %v155_v45 }
 0x235   :  { %v409_v46 = vpop.eup %408 }
 0x236   :  { %v158_v47 = vmul.f32 %v409_v46, %v142_v25 }
 0x238   :  { %v166_v50 = vmul.f32 %v352_v48, %v158_v47 }
 0x239   :  { %v411_v49 = vpop.eup %410 }
 0x23a   :  { %v159_v51 = vmul.f32 %v411_v49, %v143_v29  ;;  %v174_v54 = vadd.f32 %v353_v52, %v166_v50 }
 0x23c   :  { %v167_v53 = vmul.f32 %v352_v48, %v159_v51 }
 0x23e   :  { %v175_v55 = vadd.f32 %v353_v52, %v167_v53 }
 0x240   :  { %v176_v56 = vpack.c.bf16 %v175_v55, %v174_v54 }
 0x242   :  { %177 = vst.msk [vmem:[#allocation2] sm:$0xff] %vm78_vm1, %v176_v56 }
 0x249   :  { %v178_v57 = vld [vmem:[#allocation2] sm:$0xff] }
 0x24a   :  { %360 = vmatmul.mubr.msk.bf16.vlgmr.msra.gmra.mrb[0].mxu1 %vm78_vm1, %v178_v57  ;;  %381 = vmatmul.mubr.msk.bf16.vlgmr.msra.gmra.mrb[4].mxu0 %vm78_vm1, %v178_v57 }
 0x31d   :  { %v274_v3 = vpop.f32.mrb[0].mxu1  ;;  %v317_v4 = vpop.f32.mrb[4].mxu0 }
 0x31e   :  { %v275_v5 = vadd.f32 %v274_v3, %v192_v0  ;;  %v318_v6 = vadd.f32 %v317_v4, %v200_v1  ;;  %v276_v7 = vpop.f32.mrb[1].mxu1  ;;  %v382_v8 = vpop.f32.mrb[5].mxu0 }
 0x31f   :  { %v277_v9 = vadd.f32 %v276_v7, %v196_v2  ;;  %v278_v10 = vpop.f32.mrb[2].mxu1  ;;  %v320_v11 = vpop.f32.mrb[6].mxu0 }
 0x320   :  { %324 = vst [vmem:[#allocation6] sm:$0xff] %v275_v5  ;;  %326 = vst [vmem:[#allocation6 + $0x10] sm:$0xff] %v318_v6  ;;  %v279_v12 = vadd.f32 %v278_v10, %v192_v0  ;;  %v321_v13 = vadd.f32 %v320_v11, %v200_v1  ;;  %v280_v14 = vpop.f32.mrb[3].mxu1  ;;  %v383_v15 = vpop.f32.mrb[7].mxu0 }
 0x321   :  { %325 = vst [vmem:[#allocation6 + $0x8] sm:$0xff] %v277_v9  ;;  %v281_v16 = vadd.f32 %v280_v14, %v196_v2 }
 0x322   :  { %327 = vst [vmem:[#allocation6 + $0x18] sm:$0xff] %v279_v12  ;;  %329 = vst [vmem:[#allocation6 + $0x28] sm:$0xff] %v321_v13 }
 0x323   :  { %328 = vst [vmem:[#allocation6 + $0x20] sm:$0xff] %v281_v16 }
 0x324   :  { %445 = shalt.err (!%p442_p12)
}
 0x325   :  { %s446_s27 = scalar_lea.hbm %s569_s7, 768 }
 0x326   :  { %p447_p13 = scmp.ne.s32.totalorder %s569_s7, %s446_s27  ;;  %p450_p0 = scmp.lt.u32.totalorder %s446_s27, %s569_s7 }
 0x328   :  { %p452_p1 = pnand %p450_p0, %p447_p13 }
 0x32a   :  { %455 = shalt.err (!%p452_p1)
}
 0x32b   :  { %s467_s9 = smov 384   ;;  %s468_s10 = smov 24  }
 0x32c   :  { %341 = dma.vmem_to_hbm [thread:$0]  %s336_s24, 768, %s569_s7, [#allocation5], %s467_s9, %s467_s9, %s468_s10  }
 0x32d   :  { %458 = dma.done.wait [#allocation5], 768  }
 0x32e   :  { %459 = vsyncadd [#allocation5], 4294966528 }
 0x32f   :  { %345 = vsyncpa [#allocation4], 1 }
 0x330   :  { %346 = vsyncpa [#allocation5], 1 }

</bundles_post_ra>
